<compile_context>
chip_gen: v7x
topology: tpu7x:2x2x1
jax: 0.10.0
libtpu: 0.0.40
codegen_flags: <defaults>
</compile_context>

<pallas_src>
import functools

import jax
import jax.numpy as jnp
from jax.experimental import pallas as pl
from jax.experimental.pallas import tpu as pltpu

_VMEM_LIMIT = 48 * 1024 * 1024   # <= v7x's 64 MiB physical VMEM; fine on v5e/v6e
_VMEM_BUDGET = 40 * 1024 * 1024  # headroom for compiler scratch when sizing tiles


def _ffn_kernel(x_ref, w1_ref, b1_ref, w2_ref, b2_ref, o_ref, acc_ref):
    """grid = (M tiles, H tiles). The H axis is a reduction into acc_ref."""
    h_step = pl.program_id(1)

    @pl.when(h_step == 0)
    def _():
        # Fuse the b2 bias into the accumulator init (drops the epilogue add).
        acc_ref[...] = jnp.broadcast_to(
            b2_ref[...].astype(jnp.float32), acc_ref.shape)

    # Native-dtype operands straight into the MXU; accumulate in f32.
    h = jnp.dot(x_ref[...], w1_ref[...], preferred_element_type=jnp.float32)
    h = h + b1_ref[...].astype(jnp.float32)
    h = jnp.maximum(h, 0.0)
    h = h * h                                  # ReLUSquared
    acc_ref[...] += jnp.dot(h.astype(w2_ref.dtype), w2_ref[...],
                            preferred_element_type=jnp.float32)

    @pl.when(h_step == pl.num_programs(1) - 1)
    def _():
        o_ref[...] = acc_ref[...].astype(o_ref.dtype)


def _row_tile(M, dtype):
    """Row tile: multiple of the sublane packing, >=2 grid steps when possible."""
    min_rows = 16 if jnp.dtype(dtype) == jnp.dtype(jnp.bfloat16) else 8
    if M <= min_rows:
        return M
    return min(512, max(min_rows, ((M // 2) // min_rows) * min_rows))


def _vmem_bytes(E, tm, th, itemsize):
    w_tiles = 2 * 2 * E * th * itemsize        # W1 + W2 blocks, double-buffered
    xo_tiles = 2 * 2 * tm * E * itemsize       # x + out blocks, double-buffered
    acc = tm * E * 4                           # f32 accumulator scratch
    hbuf = 2 * tm * th * 4                     # f32 intermediate h (headroom)
    bias = 4 * (th + E) * 4                    # bias tiles (double-buffered)
    return w_tiles + xo_tiles + acc + hbuf + bias


def _hidden_tile(E, H, tm, itemsize, budget_bytes):
    """Largest multiple of 128 that divides H and fits the VMEM budget."""
    if H <= 128 or H % 128 != 0:
        return H
    for th in range(H, 127, -128):
        if H % th == 0 and _vmem_bytes(E, tm, th, itemsize) <= budget_bytes:
            return th
    return 128


@functools.partial(jax.jit, static_argnames=("tm", "th"))
def feed_forward(x, w1, b1, w2, b2, *, tm=None, th=None):
    """x: [..., E]; w1: [E, 4E], b1: [4E], w2: [4E, E], b2: [E]."""
    orig_shape = x.shape
    E = orig_shape[-1]
    x2d = x.reshape(-1, E)
    M = x2d.shape[0]
    H = w1.shape[1]
    itemsize = jnp.dtype(x.dtype).itemsize

    if tm is None:
        tm = _row_tile(M, x.dtype)
    if th is None:
        th = _hidden_tile(E, H, tm, itemsize, _VMEM_BUDGET)
    if H % th != 0:
        raise ValueError(f"hidden tile th={th} must divide H={H}")

    b1_2d = b1.reshape(1, H)
    b2_2d = b2.reshape(1, E)

    grid = (pl.cdiv(M, tm), H // th)

    # Advisory cost hint for the XLA scheduler.
    flops = 2 * M * (E * H + H * E)
    bytes_accessed = int(
        2 * M * E * itemsize                                   # x in + out
        + grid[0] * 2 * E * H * jnp.dtype(w1.dtype).itemsize   # weights / M-tile
        + (H + E) * jnp.dtype(b1.dtype).itemsize)

    out = pl.pallas_call(
        _ffn_kernel,
        out_shape=jax.ShapeDtypeStruct((M, E), x.dtype),
        grid_spec=pltpu.PrefetchScalarGridSpec(
            num_scalar_prefetch=0,
            grid=grid,
            in_specs=[
                pl.BlockSpec((tm, E), lambda i, h: (i, 0)),   # x row-tile
                pl.BlockSpec((E, th), lambda i, h: (0, h)),   # W1 column-tile
                pl.BlockSpec((1, th), lambda i, h: (0, h)),   # b1 tile
                pl.BlockSpec((th, E), lambda i, h: (h, 0)),   # W2 row-tile
                pl.BlockSpec((1, E), lambda i, h: (0, 0)),    # b2 (fused into acc)
            ],
            out_specs=pl.BlockSpec((tm, E), lambda i, h: (i, 0)),
            scratch_shapes=[pltpu.VMEM((tm, E), jnp.float32)],
        ),
        compiler_params=pltpu.CompilerParams(
            dimension_semantics=("parallel", "arbitrary"),
            vmem_limit_bytes=_VMEM_LIMIT),
        cost_estimate=pl.CostEstimate(
            flops=flops, transcendentals=0, bytes_accessed=bytes_accessed),
    )(x2d, w1, b1_2d, w2, b2_2d)
    return out.reshape(orig_shape)


def init_params(key, embed_size, n_layer, dtype=jnp.float32):
    """Deterministic init matching the PyTorch module's __init__."""
    std = 0.02 * (2 * n_layer) ** (-0.5)
    k1, k2 = jax.random.split(key)
    hidden = embed_size * 4
    # stored pre-transposed relative to nn.Linear.weight ([out, in] -> [in, out])
    w1 = (jax.random.normal(k1, (embed_size, hidden)) * std).astype(dtype)
    b1 = jnp.zeros((hidden,), dtype)
    w2 = (jax.random.normal(k2, (hidden, embed_size)) * std).astype(dtype)
    b2 = jnp.zeros((embed_size,), dtype)
    return w1, b1, w2, b2


if __name__ == "__main__":
    # config: embed_size=32 -> hidden=128, n_layer=2; input [batch=2, seq=8, embed=32]
    batch, seq, embed_size, n_layer = 2, 8, 32, 2
    key = jax.random.PRNGKey(0)
    kx, kp = jax.random.split(key)
    x = jax.random.normal(kx, (batch, seq, embed_size), jnp.float32)
    w1, b1, w2, b2 = init_params(kp, embed_size, n_layer)

    out = feed_forward(x, w1, b1, w2, b2)
    out = jax.block_until_ready(out)

    # reference check in plain JAX
    h_ref = jnp.maximum(x.reshape(-1, embed_size) @ w1 + b1, 0.0) ** 2
    ref = (h_ref @ w2 + b2).reshape(batch, seq, embed_size)
    assert out.shape == (batch, seq, embed_size)
    assert jnp.allclose(out, ref, atol=1e-5, rtol=1e-5)

    # second check: exercise the tiled-H accumulator path (E=128 -> H=512, th=128)
    embed2 = 128
    kx2, kp2 = jax.random.split(jax.random.PRNGKey(1))
    x2 = jax.random.normal(kx2, (batch, seq, embed2), jnp.float32)
    w1b, b1b, w2b, b2b = init_params(kp2, embed2, n_layer)
    out2 = jax.block_until_ready(feed_forward(x2, w1b, b1b, w2b, b2b, th=128))
    h2_ref = jnp.maximum(x2.reshape(-1, embed2) @ w1b + b1b, 0.0) ** 2
    ref2 = (h2_ref @ w2b + b2b).reshape(batch, seq, embed2)
    assert jnp.allclose(out2, ref2, atol=1e-4, rtol=1e-4)

    print("KERNEL_OK")
</pallas_src>

<mosaic_0001>
module attributes {stable_mosaic.version = 11 : i64} {
  func.func @_ffn_kernel(%arg0: i32, %arg1: i32, %arg2: memref<8x32xf32, #tpu.memory_space<vmem>>, %arg3: memref<32x128xf32, #tpu.memory_space<vmem>>, %arg4: memref<1x128xf32, #tpu.memory_space<vmem>>, %arg5: memref<128x32xf32, #tpu.memory_space<vmem>>, %arg6: memref<1x32xf32, #tpu.memory_space<vmem>>, %arg7: memref<8x32xf32, #tpu.memory_space<vmem>>, %arg8: memref<8x32xf32, #tpu.memory_space<vmem>>) attributes {dimension_semantics = [#tpu.dimension_semantics<parallel>, #tpu.dimension_semantics<arbitrary>], iteration_bounds = array<i64: 2, 1>, scalar_prefetch = 0 : i64, scratch_operands = 1 : i64, tpu.core_type = #tpu.core_type<tc>, window_params = [{transform_indices = @transform_0, window_bounds = array<i64: 8, 32>}, {transform_indices = @transform_1, window_bounds = array<i64: 32, 128>}, {transform_indices = @transform_2, window_bounds = array<i64: 1, 128>}, {transform_indices = @transform_3, window_bounds = array<i64: 128, 32>}, {pipeline_mode = #tpu.pipeline_mode<synchronous>, transform_indices = @transform_4, window_bounds = array<i64: 1, 32>}, {transform_indices = @transform_5, window_bounds = array<i64: 8, 32>}]} {
    %c0_i32 = arith.constant 0 : i32
    %0 = arith.cmpi eq, %arg1, %c0_i32 : i32
    %1 = arith.extui %0 : i1 to i32
    %c0_i32_0 = arith.constant 0 : i32
    %2 = arith.cmpi ne, %1, %c0_i32_0 : i32
    scf.if %2 {
      %c0_16 = arith.constant 0 : index
      %c0_17 = arith.constant 0 : index
      %20 = vector.load %arg6[%c0_16, %c0_17] : memref<1x32xf32, #tpu.memory_space<vmem>>, vector<1x32xf32>
      %21 = vector.shape_cast %20 : vector<1x32xf32> to vector<1x32xf32>
      %22 = vector.broadcast %21 : vector<1x32xf32> to vector<8x32xf32>
      %c0_18 = arith.constant 0 : index
      %c0_19 = arith.constant 0 : index
      %23 = vector.load %arg8[%c0_18, %c0_19] : memref<8x32xf32, #tpu.memory_space<vmem>>, vector<8x32xf32>
      tpu.vector_store %arg8[%c0_18, %c0_19], %22 {strides = array<i32>} : memref<8x32xf32, #tpu.memory_space<vmem>>, vector<8x32xf32>,
    } else {
    }
    %c0 = arith.constant 0 : index
    %c0_1 = arith.constant 0 : index
    %3 = vector.load %arg2[%c0, %c0_1] : memref<8x32xf32, #tpu.memory_space<vmem>>, vector<8x32xf32>
    %c0_2 = arith.constant 0 : index
    %c0_3 = arith.constant 0 : index
    %4 = vector.load %arg3[%c0_2, %c0_3] : memref<32x128xf32, #tpu.memory_space<vmem>>, vector<32x128xf32>
    %cst = arith.constant dense<0.000000e+00> : vector<8x128xf32>
    %5 = tpu.matmul %3, %4, %cst {dimension_numbers = #tpu.dot_dimension_numbers<[1], [0], [0], [1], [0, 0, 1, 1], [], []>} : vector<8x32xf32>, vector<32x128xf32>, vector<8x128xf32> -> vector<8x128xf32>
    %c0_4 = arith.constant 0 : index
    %c0_5 = arith.constant 0 : index
    %6 = vector.load %arg4[%c0_4, %c0_5] : memref<1x128xf32, #tpu.memory_space<vmem>>, vector<1x128xf32>
    %7 = vector.broadcast %6 : vector<1x128xf32> to vector<8x128xf32>
    %8 = arith.addf %5, %7 : vector<8x128xf32>
    %cst_6 = arith.constant 0.000000e+00 : f32
    %9 = vector.broadcast %cst_6 : f32 to vector<8x128xf32>
    %10 = arith.maximumf %8, %9 : vector<8x128xf32>
    %11 = arith.mulf %10, %10 : vector<8x128xf32>
    %c0_7 = arith.constant 0 : index
    %c0_8 = arith.constant 0 : index
    %12 = vector.load %arg8[%c0_7, %c0_8] : memref<8x32xf32, #tpu.memory_space<vmem>>, vector<8x32xf32>
    %c0_9 = arith.constant 0 : index
    %c0_10 = arith.constant 0 : index
    %13 = vector.load %arg5[%c0_9, %c0_10] : memref<128x32xf32, #tpu.memory_space<vmem>>, vector<128x32xf32>
    %cst_11 = arith.constant dense<0.000000e+00> : vector<8x32xf32>
    %14 = tpu.matmul %11, %13, %cst_11 {dimension_numbers = #tpu.dot_dimension_numbers<[1], [0], [0], [1], [0, 0, 1, 1], [], []>} : vector<8x128xf32>, vector<128x32xf32>, vector<8x32xf32> -> vector<8x32xf32>
    %15 = arith.addf %12, %14 : vector<8x32xf32>
    %c0_12 = arith.constant 0 : index
    %c0_13 = arith.constant 0 : index
    %16 = vector.load %arg8[%c0_12, %c0_13] : memref<8x32xf32, #tpu.memory_space<vmem>>, vector<8x32xf32>
    tpu.vector_store %arg8[%c0_12, %c0_13], %15 {strides = array<i32>} : memref<8x32xf32, #tpu.memory_space<vmem>>, vector<8x32xf32>,
    %c0_i32_14 = arith.constant 0 : i32
    %17 = arith.cmpi eq, %arg1, %c0_i32_14 : i32
    %18 = arith.extui %17 : i1 to i32
    %c0_i32_15 = arith.constant 0 : i32
    %19 = arith.cmpi ne, %18, %c0_i32_15 : i32
    scf.if %19 {
      %c0_16 = arith.constant 0 : index
      %c0_17 = arith.constant 0 : index
      %20 = vector.load %arg8[%c0_16, %c0_17] : memref<8x32xf32, #tpu.memory_space<vmem>>, vector<8x32xf32>
      %c0_18 = arith.constant 0 : index
      %c0_19 = arith.constant 0 : index
      %21 = vector.load %arg7[%c0_18, %c0_19] : memref<8x32xf32, #tpu.memory_space<vmem>>, vector<8x32xf32>
      tpu.vector_store %arg7[%c0_18, %c0_19], %20 {strides = array<i32>} : memref<8x32xf32, #tpu.memory_space<vmem>>, vector<8x32xf32>,
    } else {
    }
    return
  }
  func.func @transform_0(%arg0: i32, %arg1: i32) -> (i32, i32) {
    %c0_i32 = arith.constant 0 : i32
    %c0_i32_0 = arith.constant 0 : i32
    return %arg0, %c0_i32 : i32, i32
  }
  func.func @transform_1(%arg0: i32, %arg1: i32) -> (i32, i32) {
    %c0_i32 = arith.constant 0 : i32
    %c0_i32_0 = arith.constant 0 : i32
    return %c0_i32, %arg1 : i32, i32
  }
  func.func @transform_2(%arg0: i32, %arg1: i32) -> (i32, i32) {
    %c0_i32 = arith.constant 0 : i32
    %c0_i32_0 = arith.constant 0 : i32
    return %c0_i32, %arg1 : i32, i32
  }
  func.func @transform_3(%arg0: i32, %arg1: i32) -> (i32, i32) {
    %c0_i32 = arith.constant 0 : i32
    %c0_i32_0 = arith.constant 0 : i32
    return %arg1, %c0_i32 : i32, i32
  }
  func.func @transform_4(%arg0: i32, %arg1: i32) -> (i32, i32) {
    %c0_i32 = arith.constant 0 : i32
    %c0_i32_0 = arith.constant 0 : i32
    %c0_i32_1 = arith.constant 0 : i32
    return %c0_i32, %c0_i32_0 : i32, i32
  }
  func.func @transform_5(%arg0: i32, %arg1: i32) -> (i32, i32) {
    %c0_i32 = arith.constant 0 : i32
    %c0_i32_0 = arith.constant 0 : i32
    return %arg0, %c0_i32 : i32, i32
  }
}

</mosaic_0001>

<bundles_post_ra>
// kernel: feed_forward.1
= control target key start
LH: loop header
LB: loop body
LE: loop exit
PB: predicated region body
PF: predicated region fallthrough
CT: control target
= control target key end

     0   :  { %10 = vsyncpa [#allocation4], 0  ;;  %s1072_s0 = inlined_call_operand.vmem [shape: f32[16,32], index: 0, kind: input, shape index: {}]   ;;  %s1073_s1 = inlined_call_operand.vmem [shape: f32[32,128], index: 1, kind: input, shape index: {}]   ;;  %s1074_s2 = inlined_call_operand.vmem [shape: f32[1,128], index: 2, kind: input, shape index: {}]   ;;  %s1075_s3 = inlined_call_operand.vmem [shape: f32[128,32], index: 3, kind: input, shape index: {}]   ;;  %s1076_s4 = inlined_call_operand.vmem [shape: f32[1,32], index: 4, kind: input, shape index: {}]   ;;  %s1077_s5 = inlined_call_operand.hbm [shape: f32[16,32], index: 5, kind: output, shape index: {}]  }
   0x1   :  { %12 = vsyncpa [#allocation4 + $0x1], 0  ;;  %s890_s18 = smov 0   ;;  %s892_s19 = smov 0  }
   0x2   :  { %s894_s20 = smov 0   ;;  %s896_s21 = smov 0  }
   0x3   :  { %s898_s22 = smov 0   ;;  %s900_s23 = smov 0  }
   0x4 LB: > { %s603_s24 = sadd.s32 4294967295, %s854_s23   ;;  %s604_s25 = sadd.s32 4294967294, %s854_s23   ;;  %s854_s23 = sphi %s900_s23, %s18_s23   ;;  %s850_s22 = sphi %s898_s22, %s1084_s22   ;;  %s846_s21 = sphi %s896_s21, %s1083_s21   ;;  %s842_s20 = sphi %s894_s20, %s1082_s20   ;;  %s838_s19 = sphi %s892_s19, %s1081_s19   ;;  %s834_s18 = sphi %s890_s18, %s1080_s18  }
   0x5   : > { %s30_s26 = sadd.s32 1, %s850_s22  ;;  %s162_s27 = sadd.s32 1, %s842_s20 }
   0x6   : > { %p32_p0 = scmp.ge.s32.totalorder %s30_s26, 2  ;;  %p172_p1 = scmp.ne.s32.totalorder %s842_s20, %s838_s19 }
   0x7   : > { %p173_p2 = scmp.eq.s32.totalorder %s603_s24, 1  ;;  %p178_p3 = scmp.ne.s32.totalorder %s838_s19, %s834_s18 }
   0x8   : > { %s1086_s26 = smov (%p32_p0, %s30_s26), 0  ;;  %p179_p5 = scmp.eq.s32.totalorder %s604_s25, 1 }
   0x9   : > { %p930_p4 = por %p173_p2, %p172_p1  ;;  %s159_s29 = ssub.s32 %s850_s22, %s1086_s26 }
   0xa   : > { %p610_p6 = scmp.ge.s32.totalorder %s854_s23, 1  ;;  %p160_p7 = scmp.eq.s32.totalorder %s159_s29, 0 }
   0xb   : > { %p937_p8 = por %p179_p5, %p178_p3  ;;  %p229_p9 = scmp.lt.s32.totalorder %s854_s23, 3 }
   0xc   : > { %s943_s6 = scalar_select %p160_p7, %s842_s20, %s162_s27  }
   0xd   : > { %p230_p10 = pnand %p610_p6, %p229_p9 }
   0xe   : > { %v299_v0 = vld [vmem:[%s1073_s1] sm:$0xff] (!%p230_p10)  ;;  %v300_v1 = vld [vmem:[%s1073_s1 + $0x8] sm:$0xff] (!%p230_p10)  ;;  %v301_v2 = vld [vmem:[%s1073_s1 + $0x10] sm:$0xff] (!%p230_p10)  ;;  %v856_v3 = vmov (!%p230_p10), 0.0|0.0   ;;  %vm857_vm0 = vmmov (!%p230_p10), 0   ;;  %v858_v6 = vmov (!%p230_p10), 0.0  }
   0xf   : > { %233 = sbr.rel (%p230_p10) target bundleno = 481 (0x1e1), region = 40  ;;  %688 = vmatprep.subr.bf16.mxu0 (!%p230_p10), %v856_v3  ;;  %v689_v4 = vpack.c.bf16 (!%p230_p10), %v300_v1, %v299_v0  ;;  %v302_v5 = vld [vmem:[%s1073_s1 + $0x18] sm:$0xff] (!%p230_p10)  ;;  %650 = vmatprep.mubr.msk.f32.mxu0 (!%p230_p10), %vm857_vm0, %v858_v6  ;;  %p268_p11 = scmp.lt.s32.totalorder (!%p230_p10), %s846_s21, 1  ;;  %v613_v7 = vld [vmem:[%s1076_s4] ss:$0 sm:$0xff] (!%p230_p10)  ;;  %vm296_vm1 = vcmask (!%p230_p10), 261120  }
  0x10   : > { %v387_v8 = vld [vmem:[%s1075_s3] sm:$0xff] (!%p230_p10)  ;;  %297 = vst.msk [vmem:[#allocation2] sm:$0xff] (!%p230_p10), %vm296_vm1, %v613_v7  ;;  %694 = vmatprep.subr.bf16.mxu1 (!%p230_p10), %v856_v3  ;;  %v388_v9 = vld [vmem:[%s1075_s3 + $0x8] sm:$0xff] (!%p230_p10)  ;;  %v389_v10 = vld [vmem:[%s1075_s3 + $0x10] sm:$0xff] (!%p230_p10)  ;;  %685 = vmatprep.mubr.msk.f32.mxu1 (!%p230_p10), %vm857_vm0, %v858_v6  ;;  %v692_v12 = vpack.c.bf16 (!%p230_p10), %v302_v5, %v301_v2  ;;  %s617_s13 = sshll.u32 (!%p230_p10), %s846_s21, 7 }
  0x11   : > { %v390_v11 = vld [vmem:[%s1075_s3 + $0x18] sm:$0xff] (!%p230_p10)  ;;  %690 = vmatpush3.bf16.msra.mxu0 (!%p230_p10), %v689_v4  ;;  %v695_v13 = vpack.c.bf16 (!%p230_p10), %v388_v9, %v387_v8  ;;  %v391_v15 = vld [vmem:[%s1075_s3 + $0x20] sm:$0xff] (!%p230_p10)  ;;  %v392_v16 = vld [vmem:[%s1075_s3 + $0x28] sm:$0xff] (!%p230_p10)  ;;  %s1024_s24 = scalar_lea.hbm (!%p230_p10), %s1077_s5, %s617_s13 }
  0x12   : > { %691 = vmatprep.subr.bf16.mxu0 (!%p230_p10), %v856_v3  ;;  %v698_v14 = vpack.c.bf16 (!%p230_p10), %v390_v11, %v389_v10  ;;  %v701_v18 = vpack.c.bf16 (!%p230_p10), %v392_v16, %v391_v15  ;;  %v393_v19 = vld [vmem:[%s1075_s3 + $0x30] sm:$0xff] (!%p230_p10)  ;;  %v394_v20 = vld [vmem:[%s1075_s3 + $0x38] sm:$0xff] (!%p230_p10)  ;;  %v395_v22 = vld [vmem:[%s1075_s3 + $0x40] sm:$0xff] (!%p230_p10) }
  0x13   : > { %696 = vmatpush3.bf16.msra.mxu1 (!%p230_p10), %v695_v13  ;;  %v704_v21 = vpack.c.bf16 (!%p230_p10), %v394_v20, %v393_v19  ;;  %v396_v23 = vld [vmem:[%s1075_s3 + $0x48] sm:$0xff] (!%p230_p10)  ;;  %v397_v25 = vld [vmem:[%s1075_s3 + $0x50] sm:$0xff] (!%p230_p10)  ;;  %v398_v26 = vld [vmem:[%s1075_s3 + $0x58] sm:$0xff] (!%p230_p10) }
  0x14   : > { %697 = vmatprep.subr.bf16.mxu1 (!%p230_p10), %v856_v3  ;;  %v707_v24 = vpack.c.bf16 (!%p230_p10), %v396_v23, %v395_v22  ;;  %v710_v27 = vpack.c.bf16 (!%p230_p10), %v398_v26, %v397_v25  ;;  %v399_v28 = vld [vmem:[%s1075_s3 + $0x60] sm:$0xff] (!%p230_p10)  ;;  %v400_v29 = vld [vmem:[%s1075_s3 + $0x68] sm:$0xff] (!%p230_p10)  ;;  %v401_v31 = vld [vmem:[%s1075_s3 + $0x70] sm:$0xff] (!%p230_p10) }
  0x15   : > { %693 = vmatpush3.bf16.msra.mxu0 (!%p230_p10), %v692_v12  ;;  %v713_v30 = vpack.c.bf16 (!%p230_p10), %v400_v29, %v399_v28  ;;  %v402_v32 = vld [vmem:[%s1075_s3 + $0x78] sm:$0xff] (!%p230_p10)  ;;  %v614_v34 = vld [vmem:[%s1074_s2] ss:$0 sm:$0xff] (!%p230_p10) }
  0x16   : > { %s269_s10 = scalar_select %p268_p11, %s846_s21, 1  ;;  %v716_v33 = vpack.c.bf16 %v402_v32, %v401_v31 }
  0x17   : > { %699 = vmatpush3.bf16.msra.mxu1 %v698_v14  ;;  %v386_v40 = vld [vmem:[#allocation2] sm:$0xff]  ;;  %s859_s21 = smov [#allocation3]  }
  0x18   : > { %s612_s11 = sshll.u32 %s269_s10, 3  ;;  %700 = vmatprep.subr.bf16.mxu1 %v856_v3  ;;  %s780_s29 = sshll.u32 %s859_s21, 4  ;;  %s781_s29 = int_to_ptr.vmem [resolvable:$false] %s780_s29 }
  0x19   : > { %s271_s14 = scalar_lea.vmem %s1072_s0, %s612_s11  ;;  %s265_s11 = sand.u32 1, %s838_s19  }
  0x1a   : > { %v298_v17 = vld [vmem:[%s271_s14] sm:$0xff]  ;;  %s611_s12 = sshll.u32 %s265_s11, 3  ;;  %s481_s25 = scalar_lea.sflag [#allocation4], %s265_s11 }
  0x1b   : > { %651 = vmatmul.mubr.msk.f32.vlgmr.msra.gmra.mrb[0].mxu0 %vm296_vm1, %v298_v17  ;;  %702 = vmatpush3.bf16.msra.mxu1 %v701_v18  ;;  %s267_s14 = scalar_lea.vmem [#allocation3], %s611_s12  ;;  %s782_s7 = scalar_lea.vmem %s781_s29, 256 }
  0x1c   : > { %703 = vmatprep.subr.bf16.mxu1 %v856_v3  ;;  %s494_s15 = sshll.u32 %s267_s14, 4  ;;  %s1026_s15 = int_to_ptr.vmem [resolvable:$true] %s494_s15 }
  0x1d   : > { %s776_s27 = scalar_lea.vmem %s1026_s15, 128  ;;  %p783_p1 = scmp.lt.s32.totalorder %s1026_s15, %s781_s29 }
  0x1e   : > { %p777_p12 = scmp.ne.s32.totalorder %s1026_s15, %s776_s27  ;;  %p784_p2 = scmp.lt.s32.totalorder %s782_s7, %s776_s27 }
  0x1f   : > { %705 = vmatpush3.bf16.msra.mxu1 %v704_v21 }
  0x20   : > { %706 = vmatprep.subr.bf16.mxu1 %v856_v3  ;;  %p778_p13 = pnand %p777_p12, %p930_p4  ;;  %p785_p3 = por %p784_p2, %p783_p1 }
  0x22   : > { %p779_p0 = pneg %p778_p13 }
  0x23   : > { %708 = vmatpush3.bf16.msra.mxu1 %v707_v24 }
  0x24   : > { %709 = vmatprep.subr.bf16.mxu1 %v856_v3  ;;  %p786_p5 = pnand %p785_p3, %p779_p0 }
  0x27   : > { %711 = vmatpush3.bf16.msra.mxu1 %v710_v27 }
  0x28   : > { %712 = vmatprep.subr.bf16.mxu1 %v856_v3 }
  0x2b   : > { %714 = vmatpush3.bf16.msra.mxu1 %v713_v30 }
  0x2c   : > { %715 = vmatprep.subr.bf16.mxu1 %v856_v3 }
  0x2f   : > { %717 = vmatpush3.bf16.msra.mxu1 %v716_v33 }
  0xee   : > { %v380_v35 = vpop.f32.mrb[0].mxu0 }
  0xef   : > { %v381_v36 = vadd.f32 %v614_v34, %v380_v35  ;;  %v652_v37 = vpop.f32.mrb[1].mxu0 }
  0xf1   : > { %v384_v38 = vmax.f32 %v381_v36, 0.0 }
  0xf3   : > { %v385_v39 = vmul.f32 %v384_v38, %v384_v38 }
  0xf5   : > { %686 = vmatmul.mubr.f32.vlgmr.msra.gmra.mrb[0].mxu1 %v385_v39 }
 0x1c8   : > { %v469_v41 = vpop.f32.mrb[0].mxu1 }
 0x1c9   : > { %v473_v42 = vadd.f32 %v469_v41, %v386_v40  ;;  %v687_v43 = vpop.f32.mrb[1].mxu1 }
 0x1cb   : > { %474 = vst.msk [vmem:[#allocation2] sm:$0xff] %vm296_vm1, %v473_v42 }
 0x1d2   : > { %v478_v44 = vld [vmem:[#allocation2] sm:$0xff] }
 0x1d3   : > { %479 = vst.msk [vmem:[%s267_s14] sm:$0xff] %vm296_vm1, %v478_v44 }
 0x1d4   : > { %789 = shalt.err (!%p786_p5)
}
 0x1d5   : > { %s790_s8 = scalar_lea.hbm %s1024_s24, 128  ;;  %s794_s11 = scalar_lea.hbm %s1077_s5, 256 }
 0x1d6   : > { %p791_p6 = scmp.ne.s32.totalorder %s1024_s24, %s790_s8  ;;  %p795_p10 = scmp.lt.u32.totalorder %s1024_s24, %s1077_s5 }
 0x1d7   : > { %p796_p11 = scmp.lt.u32.totalorder %s794_s11, %s790_s8  ;;  %p798_p13 = scmp.lt.u32.totalorder %s790_s8, %s1024_s24 }
 0x1d8   : > { %p792_p7 = pnand %p791_p6, %p930_p4 }
 0x1d9   : > { %p797_p12 = por %p796_p11, %p795_p10 }
 0x1da   : > { %p793_p9 = pneg %p792_p7 }
 0x1db   : > { %p799_p0 = por %p798_p13, %p797_p12 }
 0x1dd   : > { %p800_p1 = pnand %p799_p0, %p793_p9 }
 0x1df   : > { %803 = shalt.err (!%p800_p1)
}
 0x1e0   : > { %718 = dma.vmem_to_hbm [thread:$0]  (%p930_p4), %s1026_s15, 128, %s1024_s24, %s481_s25  }
 0x1e1 PF: > { %p724_p2 = scmp.ge.s32.totalorder %s854_s23, 2  ;;  %s506_s14 = sand.u32 1, %s834_s18  }
 0x1e2   : > { %s507_s16 = scalar_lea.sflag [#allocation4], %s506_s14 }
 0x1e3   : > { %p721_p3 = pnand %p724_p2, %p937_p8 }
 0x1e5   : > { %829 = dma.done.wait (!%p721_p3), %s507_s16, 128  }
 0x1e6   : > { %831 = vsyncadd (!%p721_p3), %s507_s16, 4294967168  ;;  %s18_s23 = sadd.s32 1, %s854_s23   ;;  %s1080_s18 = smov %s838_s19 }
 0x1e7   : > { %p15_p5 = scmp.ge.s32.totalorder %s18_s23, 4   ;;  %s1081_s19 = smov %s842_s20 }
 0x1e8   : > { %s1082_s20 = smov %s943_s6  ;;  %s1083_s21 = smov %s850_s22 }
 0x1e9   : > { %s1084_s22 = smov %s1086_s26  ;;  %17 = sbr.rel (!%p15_p5) target bundleno = 4 (0x4), region = 92 }
 0x1f0   :  { %512 = vsyncpa [#allocation4], 1 }
 0x1f1   :  { %514 = vsyncpa [#allocation4 + $0x1], 1 }

</bundles_post_ra>
